<compile_context>
chip_gen: v5e
topology: v5e:2x2
jax: 0.10.0
libtpu: 0.0.40
codegen_flags: <defaults>
</compile_context>

<pallas_src>
import jax
import jax.numpy as jnp
from jax import lax
from jax.experimental import pallas as pl
from jax.experimental.pallas import tpu as pltpu


RAW_TEXT = ('We are about to study the idea of a computational process.\n'
            'Computational processes are abstract beings that inhabit computers.\n'
            'As they evolve, processes manipulate other abstract things called data.\n'
            'The evolution of a process is directed by a pattern of rules\n'
            'called a program. People create programs to direct processes. In effect,\n'
            'we conjure the spirits of the computer with our spells.').split()

VOCAB = sorted(set(RAW_TEXT))          # deterministic ordering
VOCAB_SIZE = len(VOCAB)
EMBED_SIZE = 32
CONT_SIZE = 4                          # 2 * CONTEXT_SIZE context words
TILE_B = 8                             # batch rows per grid step (B=16 -> 2 grid steps)


def _round_up(x, m):
    return ((x + m - 1) // m) * m


def cbow_kernel(idx_ref, m_ref, b_ref, out_ref):
    """Fused embedding-gather-sum + linear + softmax for one batch tile.

    idx_ref : VMEM (TILE_B, 128) int32 -- context word ids in lanes [0, CONT_SIZE)
    m_ref   : VMEM (V_pad, V_pad) f32  -- precomputed emb @ W^T, zero padded
    b_ref   : VMEM (1, V_pad) f32      -- Linear bias, padded lanes = -1e30
    out_ref : VMEM (TILE_B, V_pad) f32 -- softmax probabilities for this batch tile
    """
    tb, v_pad = out_ref.shape

    # Vectorized one-hot gather: counts[r, v] = #{c : idx[r, c] == v}.
    # Lane iota + CONT_SIZE broadcast-compares; all VPU work, no scalar chain.
    idx = idx_ref[...]                                         # (tb, 128) int32
    lane = lax.broadcasted_iota(jnp.int32, (tb, v_pad), 1)     # vocab index per lane
    counts = jnp.zeros((tb, v_pad), jnp.float32)
    for c in range(CONT_SIZE):                                 # static, CONT_SIZE = 4
        counts = counts + (lane == idx[:, c:c + 1]).astype(jnp.float32)

    # Fused linear: emb_vec @ W^T = counts @ (emb @ W^T).  Single MXU matmul.
    logits = jnp.dot(counts, m_ref[...],
                     preferred_element_type=jnp.float32) + b_ref[...]

    # Row-wise softmax over the vocab (lane) dimension.  Padded lanes carry a
    # -1e30 bias so exp() underflows to exactly 0 and they drop out of the sum.
    # TODO(synk): the original forward returns an nn.Softmax *module* (a bug);
    # we apply softmax(logits) over the vocab dim as clearly intended.
    mx = jnp.max(logits, axis=-1, keepdims=True)
    e = jnp.exp(logits - mx)
    s = jnp.sum(e, axis=-1, keepdims=True)
    out_ref[...] = e / s


def cbow_forward(indices, emb_table, w, b):
    """Batched CBOW forward.

    indices   : (B, CONT_SIZE) int32  -- each row is one context (one module forward)
    emb_table : (V, E) f32
    w         : (V, E) f32            -- nn.Linear weight
    b         : (V,)   f32            -- nn.Linear bias
    returns   : (B, V_pad) f32 softmax probabilities; lanes [V:] are exactly 0.
                (Kept padded on purpose — slicing here would be an extra HBM copy.)
    """
    B, cont = indices.shape
    V, E = emb_table.shape
    assert cont == CONT_SIZE
    assert B % TILE_B == 0, "batch must be a multiple of TILE_B"

    V_pad = _round_up(V, 128)          # lane-dense vocab axis
    CONT_PAD = 128                     # lane-dense index tile (pad lanes unused)

    # One-time wrapper-side glue: fuse emb @ W^T (exact by linearity of the sum),
    # pad everything to clean (8,128)/MXU tiles.
    # TODO(synk): only valid for toy vocab (M is V x V); for large V keep two matmuls
    # (counts @ emb, act @ W^T) and add a vocab grid axis for the output/weights.
    m_fused = emb_table @ w.T                                        # (V, V)
    m_p = jnp.zeros((V_pad, V_pad), jnp.float32).at[:V, :V].set(m_fused)
    b_p = jnp.full((1, V_pad), -1e30, jnp.float32).at[0, :V].set(b)
    idx_p = jnp.zeros((B, CONT_PAD), jnp.int32).at[:, :CONT_SIZE].set(indices)

    out = pl.pallas_call(
        cbow_kernel,
        out_shape=jax.ShapeDtypeStruct((B, V_pad), jnp.float32),
        grid_spec=pltpu.PrefetchScalarGridSpec(
            num_scalar_prefetch=0,
            grid=(B // TILE_B,),
            in_specs=[
                pl.BlockSpec((TILE_B, CONT_PAD), lambda i: (i, 0)),
                pl.BlockSpec((V_pad, V_pad), lambda i: (0, 0)),
                pl.BlockSpec((1, V_pad), lambda i: (0, 0)),
            ],
            out_specs=pl.BlockSpec((TILE_B, V_pad), lambda i: (i, 0)),
        ),
        compiler_params=pltpu.CompilerParams(
            dimension_semantics=("parallel",)),   # v7x: one step per TensorCore
    )(idx_p, m_p, b_p)

    return out


def cbow_reference(indices, emb_table, w, b):
    emb_vec = jnp.sum(emb_table[indices], axis=1)            # (B, E)
    logits = emb_vec @ w.T + b[None, :]                      # (B, V)
    return jax.nn.softmax(logits, axis=-1)


if __name__ == "__main__":
    key = jax.random.PRNGKey(0)
    k_emb, k_w, k_b, k_idx = jax.random.split(key, 4)

    # Deterministic parameter init (matching nn.Embedding / nn.Linear shapes).
    emb_table = jax.random.normal(k_emb, (VOCAB_SIZE, EMBED_SIZE), dtype=jnp.float32)
    bound = 1.0 / (EMBED_SIZE ** 0.5)
    w = jax.random.uniform(k_w, (VOCAB_SIZE, EMBED_SIZE), jnp.float32, -bound, bound)
    b = jax.random.uniform(k_b, (VOCAB_SIZE,), jnp.float32, -bound, bound)

    # A small batch of contexts; each row == one forward pass of the original module.
    BATCH = 16
    indices = jax.random.randint(k_idx, (BATCH, CONT_SIZE), 0, VOCAB_SIZE,
                                 dtype=jnp.int32)

    probs_padded = cbow_forward(indices, emb_table, w, b)
    probs_padded = jax.block_until_ready(probs_padded)

    # Verification only (not the hot path): slice back to the real vocab width.
    probs = probs_padded[:, :VOCAB_SIZE]
    ref = cbow_reference(indices, emb_table, w, b)
    assert probs.shape == (BATCH, VOCAB_SIZE)
    assert jnp.allclose(probs, ref, atol=1e-4, rtol=1e-4), "mismatch vs JAX reference"
    assert jnp.allclose(jnp.sum(probs, axis=-1), 1.0, atol=1e-4), "rows don't sum to 1"
    assert jnp.all(probs_padded[:, VOCAB_SIZE:] == 0.0), "padded lanes must be exactly 0"

    print("KERNEL_OK")
</pallas_src>

<mosaic_0001>
module attributes {stable_mosaic.version = 11 : i64} {
  func.func @cbow_kernel(%arg0: i32, %arg1: memref<8x128xi32, #tpu.memory_space<vmem>>, %arg2: memref<128x128xf32, #tpu.memory_space<vmem>>, %arg3: memref<1x128xf32, #tpu.memory_space<vmem>>, %arg4: memref<8x128xf32, #tpu.memory_space<vmem>>) attributes {dimension_semantics = [#tpu.dimension_semantics<parallel>], iteration_bounds = array<i64: 2>, scalar_prefetch = 0 : i64, scratch_operands = 0 : i64, tpu.core_type = #tpu.core_type<tc>, window_params = [{transform_indices = @transform_0, window_bounds = array<i64: 8, 128>}, {pipeline_mode = #tpu.pipeline_mode<synchronous>, transform_indices = @transform_1, window_bounds = array<i64: 128, 128>}, {pipeline_mode = #tpu.pipeline_mode<synchronous>, transform_indices = @transform_2, window_bounds = array<i64: 1, 128>}, {transform_indices = @transform_3, window_bounds = array<i64: 8, 128>}]} {
    %c0 = arith.constant 0 : index
    %c0_0 = arith.constant 0 : index
    %0 = vector.load %arg1[%c0, %c0_0] : memref<8x128xi32, #tpu.memory_space<vmem>>, vector<8x128xi32>
    %1 = tpu.iota {dimensions = array<i32: 1>} : vector<8x128xi32>
    %cst = arith.constant 0.000000e+00 : f32
    %2 = vector.broadcast %cst : f32 to vector<8x128xf32>
    %3 = vector.extract_strided_slice %0 {offsets = [0, 0], sizes = [8, 1], strides = [1, 1]} : vector<8x128xi32> to vector<8x1xi32>
    %4 = vector.broadcast %3 : vector<8x1xi32> to vector<8x128xi32>
    %5 = arith.cmpi eq, %1, %4 : vector<8x128xi32>
    %6 = arith.extui %5 : vector<8x128xi1> to vector<8x128xi32>
    %7 = arith.sitofp %6 : vector<8x128xi32> to vector<8x128xf32>
    %8 = arith.addf %2, %7 : vector<8x128xf32>
    %9 = vector.extract_strided_slice %0 {offsets = [0, 1], sizes = [8, 1], strides = [1, 1]} : vector<8x128xi32> to vector<8x1xi32>
    %10 = vector.broadcast %9 : vector<8x1xi32> to vector<8x128xi32>
    %11 = arith.cmpi eq, %1, %10 : vector<8x128xi32>
    %12 = arith.extui %11 : vector<8x128xi1> to vector<8x128xi32>
    %13 = arith.sitofp %12 : vector<8x128xi32> to vector<8x128xf32>
    %14 = arith.addf %8, %13 : vector<8x128xf32>
    %15 = vector.extract_strided_slice %0 {offsets = [0, 2], sizes = [8, 1], strides = [1, 1]} : vector<8x128xi32> to vector<8x1xi32>
    %16 = vector.broadcast %15 : vector<8x1xi32> to vector<8x128xi32>
    %17 = arith.cmpi eq, %1, %16 : vector<8x128xi32>
    %18 = arith.extui %17 : vector<8x128xi1> to vector<8x128xi32>
    %19 = arith.sitofp %18 : vector<8x128xi32> to vector<8x128xf32>
    %20 = arith.addf %14, %19 : vector<8x128xf32>
    %21 = vector.extract_strided_slice %0 {offsets = [0, 3], sizes = [8, 1], strides = [1, 1]} : vector<8x128xi32> to vector<8x1xi32>
    %22 = vector.broadcast %21 : vector<8x1xi32> to vector<8x128xi32>
    %23 = arith.cmpi eq, %1, %22 : vector<8x128xi32>
    %24 = arith.extui %23 : vector<8x128xi1> to vector<8x128xi32>
    %25 = arith.sitofp %24 : vector<8x128xi32> to vector<8x128xf32>
    %26 = arith.addf %20, %25 : vector<8x128xf32>
    %c0_1 = arith.constant 0 : index
    %c0_2 = arith.constant 0 : index
    %27 = vector.load %arg2[%c0_1, %c0_2] : memref<128x128xf32, #tpu.memory_space<vmem>>, vector<128x128xf32>
    %cst_3 = arith.constant dense<0.000000e+00> : vector<8x128xf32>
    %28 = tpu.matmul %26, %27, %cst_3 {dimension_numbers = #tpu.dot_dimension_numbers<[1], [0], [0], [1], [0, 0, 1, 1], [], []>} : vector<8x128xf32>, vector<128x128xf32>, vector<8x128xf32> -> vector<8x128xf32>
    %c0_4 = arith.constant 0 : index
    %c0_5 = arith.constant 0 : index
    %29 = vector.load %arg3[%c0_4, %c0_5] : memref<1x128xf32, #tpu.memory_space<vmem>>, vector<1x128xf32>
    %30 = vector.broadcast %29 : vector<1x128xf32> to vector<8x128xf32>
    %31 = arith.addf %28, %30 : vector<8x128xf32>
    %cst_6 = arith.constant dense<0xFF800000> : vector<8xf32>
    %32 = vector.multi_reduction <maximumf>, %31, %cst_6 [1] : vector<8x128xf32> to vector<8xf32>
    %33 = vector.shape_cast %32 : vector<8xf32> to vector<8x1xf32>
    %34 = vector.broadcast %33 : vector<8x1xf32> to vector<8x128xf32>
    %35 = arith.subf %31, %34 : vector<8x128xf32>
    %36 = math.exp %35 : vector<8x128xf32>
    %cst_7 = arith.constant dense<0.000000e+00> : vector<8xf32>
    %37 = vector.multi_reduction <add>, %36, %cst_7 [1] : vector<8x128xf32> to vector<8xf32>
    %38 = vector.shape_cast %37 : vector<8xf32> to vector<8x1xf32>
    %39 = vector.broadcast %38 : vector<8x1xf32> to vector<8x128xf32>
    %40 = arith.divf %36, %39 : vector<8x128xf32>
    %c0_8 = arith.constant 0 : index
    %c0_9 = arith.constant 0 : index
    %41 = vector.load %arg4[%c0_8, %c0_9] : memref<8x128xf32, #tpu.memory_space<vmem>>, vector<8x128xf32>
    tpu.vector_store %arg4[%c0_8, %c0_9], %40 {strides = array<i32>} : memref<8x128xf32, #tpu.memory_space<vmem>>, vector<8x128xf32>,
    return
  }
  func.func @transform_0(%arg0: i32) -> (i32, i32) {
    %c0_i32 = arith.constant 0 : i32
    %c0_i32_0 = arith.constant 0 : i32
    return %arg0, %c0_i32 : i32, i32
  }
  func.func @transform_1(%arg0: i32) -> (i32, i32) {
    %c0_i32 = arith.constant 0 : i32
    %c0_i32_0 = arith.constant 0 : i32
    %c0_i32_1 = arith.constant 0 : i32
    return %c0_i32, %c0_i32_0 : i32, i32
  }
  func.func @transform_2(%arg0: i32) -> (i32, i32) {
    %c0_i32 = arith.constant 0 : i32
    %c0_i32_0 = arith.constant 0 : i32
    %c0_i32_1 = arith.constant 0 : i32
    return %c0_i32, %c0_i32_0 : i32, i32
  }
  func.func @transform_3(%arg0: i32) -> (i32, i32) {
    %c0_i32 = arith.constant 0 : i32
    %c0_i32_0 = arith.constant 0 : i32
    return %arg0, %c0_i32 : i32, i32
  }
}

</mosaic_0001>

<bundles_post_ra>
// kernel: tpu_custom_call.1
= control target key start
LH: loop header
LB: loop body
LE: loop exit
PB: predicated region body
PF: predicated region fallthrough
CT: control target
= control target key end

     0   :  { %8 = vsyncpa [#allocation3], 0  ;;  %s790_s0 = inlined_call_operand.hbm [shape: s32[16,128], index: 0, kind: input, shape index: {}]   ;;  %s791_s1 = inlined_call_operand.hbm [shape: f32[128,128], index: 1, kind: input, shape index: {}]   ;;  %s792_s2 = inlined_call_operand.vmem [shape: f32[1,128], index: 2, kind: input, shape index: {}]   ;;  %s793_s3 = inlined_call_operand.hbm [shape: f32[16,128], index: 3, kind: output, shape index: {}]  }
   0x1   :  { %10 = vsyncpa [#allocation3 + $0x1], 0 }
   0x2   :  { %11 = vsyncpa [#allocation6], 0 }
   0x3   :  { %12 = vsyncpa [#allocation4], 0 }
   0x4   :  { %14 = vsyncpa [#allocation4 + $0x1], 0  ;;  %s647_s12 = smov 0   ;;  %s649_s13 = smov 0  }
   0x5   :  { %s651_s14 = smov 0   ;;  %s653_s15 = smov 0  }
   0x6 LB: > { %s130_s18 = sshll.u32 %s791_s1, 4  ;;  %s671_s19 = sadd.s32 4294967295, %s617_s15   ;;  %s617_s15 = sphi %s653_s15, %s803_s15   ;;  %s613_s14 = sphi %s651_s14, %s802_s14   ;;  %s609_s13 = sphi %s649_s13, %s801_s13   ;;  %s605_s12 = sphi %s647_s12, %s800_s12   ;;  %s131_s18 = int_to_ptr.hbm [resolvable:$true] %s130_s18 }
   0x7   : > { %p396_p0 = scmp.ge.s32.totalorder %s617_s15, 1  ;;  %p41_p1 = scmp.eq.s32.totalorder %s671_s19, 0 }
   0x8   : > { %p119_p2 = scmp.lt.s32.totalorder %s617_s15, 3  ;;  %s619_s21 = smov [#allocation5]  }
   0x9   : > { %s132_s22 = sshll.u32 %s619_s21, 4  ;;  %s620_s23 = smov 128   ;;  %s133_s22 = int_to_ptr.vmem [resolvable:$true] %s132_s22 }
   0xa   : > { %p676_p3 = pnand %p396_p0, %p119_p2  ;;  %s621_s24 = smov 8  }
   0xb   : > { %s395_s25 = sadd.s32 4294967294, %s617_s15   ;;  %s687_s26 = sadd.s32 1, %s617_s15  }
   0xc   : > { %p421_p4 = pneg %p676_p3  ;;  %s27_s27 = sadd.s32 1, %s613_s14 }
   0xd   : > { %s24_s28 = ssub.s32 %s617_s15, %s687_s26  ;;  %p34_p7 = scmp.ne.s32.totalorder %s613_s14, %s609_s13 }
   0xe   : > { %p422_p6 = pnand %p421_p4, %p41_p1  ;;  %p25_p8 = scmp.eq.s32.totalorder %s24_s28, 0 }
   0xf   : > { %p35_p9 = scmp.eq.s32.totalorder %s617_s15, 0  ;;  %p40_p10 = scmp.ne.s32.totalorder %s609_s13, %s605_s12 }
  0x10   : > { %424 = dma.hbm_to_vmem [thread:$0]  (!%p422_p6), %s131_s18, 2048, %s133_s22, [#allocation6], %s620_s23, %s620_s23, %s621_s24  }
  0x11   : > { %p106_p11 = scmp.eq.s32.totalorder %s671_s19, 1  ;;  %p703_p12 = por %p41_p1, %p40_p10 }
  0x12   : > { %s699_s29 = scalar_select %p25_p8, %s613_s14, %s27_s27  }
  0x13   : > { %p707_p13 = por %p106_p11, %p34_p7  ;;  %p112_p0 = scmp.eq.s32.totalorder %s395_s25, 1 }
  0x14   : > { %p36_p2 = por %p35_p9, %p34_p7  ;;  %s149_s5 = sand.u32 1, %s613_s14  }
  0x15   : > { %p712_p4 = por %p112_p0, %p40_p10  ;;  %p434_p6 = scmp.lt.s32.totalorder %s617_s15, 2 }
  0x16   : > { %s399_s7 = sshll.u32 %s149_s5, 3  ;;  %s400_s8 = sshll.u32 %s617_s15, 3 }
  0x17   : > { %s157_s11 = scalar_lea.hbm %s790_s0, %s400_s8  ;;  %s153_s17 = scalar_lea.vmem [#allocation2], %s399_s7 }
  0x18   : > { %s159_s16 = sshll.u32 %s157_s11, 4  ;;  %s161_s18 = sshll.u32 %s153_s17, 4  ;;  %s160_s16 = int_to_ptr.hbm [resolvable:$true] %s159_s16  ;;  %s162_s18 = int_to_ptr.vmem [resolvable:$true] %s161_s18 }
  0x19   : > { %p721_p8 = pnand %p434_p6, %p36_p2  ;;  %s150_s22 = scalar_lea.sflag [#allocation3], %s149_s5 }
  0x1a   : > { %s517_s23 = sshra.s32 %s160_s16, 4  ;;  %s524_s28 = scalar_lea.hbm %s790_s0, 16  ;;  %s518_s23 = int_to_ptr.hbm [resolvable:$true] %s517_s23 }
  0x1b   : > { %s519_s24 = scalar_lea.hbm %s518_s23, 8  ;;  %p521_p9 = pneg %p721_p8 }
  0x1c   : > { %p520_p7 = scmp.ne.s32.totalorder %s518_s23, %s519_s24  ;;  %p525_p0 = scmp.lt.s32.totalorder %s518_s23, %s790_s0 }
  0x1d   : > { %p526_p2 = scmp.lt.s32.totalorder %s524_s28, %s519_s24 }
  0x1e   : > { %p522_p10 = pnand %p521_p9, %p520_p7 }
  0x1f   : > { %p527_p6 = por %p526_p2, %p525_p0 }
  0x20   : > { %p523_p11 = pneg %p522_p10 }
  0x22   : > { %p528_p5 = pnand %p527_p6, %p523_p11 }
  0x24   : > { %531 = shalt.err (!%p528_p5)
}
  0x25   : > { %428 = dma.hbm_to_vmem [thread:$0]  (!%p721_p8), %s160_s16, 128, %s162_s18, %s150_s22  }
  0x26   : > { %170 = sbr.rel (%p676_p3) target bundleno = 573 (0x23d), region = 32  ;;  %s738_s5 = sand.u32 (!%p676_p3), 1, %s609_s13  }
  0x27   : > { %s402_s9 = sshll.u32 (!%p676_p3), %s738_s5, 3  ;;  %s173_s10 = scalar_lea.sflag (!%p676_p3), [#allocation3], %s738_s5 }
  0x28   : > { %s176_s11 = scalar_lea.vmem (!%p676_p3), [#allocation2], %s402_s9 }
  0x2b   : > { %592 = dma.done.wait (%p703_p12), %s173_s10, 128  }
  0x2c   : > { %594 = vsyncadd (%p703_p12), %s173_s10, 4294967168 }
  0x2d   : > { %596 = dma.done.wait (%p41_p1), [#allocation6], 2048  }
  0x2e   : > { %598 = vsyncadd (%p41_p1), [#allocation6], 4294965248  ;;  %v622_v0 = vmov 0   ;;  %v623_v1 = vmov 2   ;;  %v205_v2 = vld [vmem:[%s176_s11] sm:$0xff]  ;;  %v249_v5 = vld [vmem:[#allocation5 + $0x68] sm:$0xff]  ;;  %v206_v21 = vlaneseq }
  0x2f   : > { %477 = vset.pattern.permute.xlu0 %v622_v0  ;;  %479 = vset.pattern.permute.xlu1 %v623_v1  ;;  %v251_v3 = vld [vmem:[#allocation5 + $0x78] sm:$0xff]  ;;  %v250_v4 = vld [vmem:[#allocation5 + $0x70] sm:$0xff]  ;;  %v248_v6 = vld [vmem:[#allocation5 + $0x60] sm:$0xff]  ;;  %v624_v8 = vmov 1   ;;  %v625_v9 = vmov 3   ;;  %v626_v27 = vmov 0.0  }
  0x30   : > { %209 = vperm.xlu0 %477, %v205_v2   ;;  %223 = vperm.xlu1 %479, %v205_v2   ;;  %v247_v7 = vld [vmem:[#allocation5 + $0x58] sm:$0xff]  ;;  %v246_v10 = vld [vmem:[#allocation5 + $0x50] sm:$0xff]  ;;  %v245_v11 = vld [vmem:[#allocation5 + $0x48] sm:$0xff]  ;;  %v207_v24 = vand.u32 127, %v206_v21  ;;  %s410_s16 = sshll.u32 %s671_s19, 3  ;;  %s204_s22 = scalar_lea.vmem [#allocation7], %s402_s9 }
  0x31   : > { %256 = vmatpush.msra.mxu0 %v251_v3  ;;  %v244_v12 = vld [vmem:[#allocation5 + $0x40] sm:$0xff]  ;;  %v243_v13 = vld [vmem:[#allocation5 + $0x38] sm:$0xff]  ;;  %v242_v14 = vld [vmem:[#allocation5 + $0x30] sm:$0xff]  ;;  %s310_s21 = scalar_lea.hbm %s793_s3, %s410_s16  ;;  %s312_s23 = sshll.u32 %s204_s22, 4  ;;  %s313_s23 = int_to_ptr.vmem [resolvable:$true] %s312_s23 }
  0x32   : > { %v241_v15 = vld [vmem:[#allocation5 + $0x28] sm:$0xff]  ;;  %v240_v16 = vld [vmem:[#allocation5 + $0x20] sm:$0xff]  ;;  %v239_v17 = vld [vmem:[#allocation5 + $0x18] sm:$0xff]  ;;  %s314_s24 = sshll.u32 %s310_s21, 4  ;;  %s300_s19 = scalar_lea.sflag [#allocation4], %s738_s5  ;;  %s315_s24 = int_to_ptr.hbm [resolvable:$true] %s314_s24 }
  0x33   : > { %257 = vmatpush.msra.mxu0 %v250_v4  ;;  %v238_v18 = vld [vmem:[#allocation5 + $0x10] sm:$0xff]  ;;  %v237_v19 = vld [vmem:[#allocation5 + $0x8] sm:$0xff]  ;;  %v236_v20 = vld [vmem:[#allocation5] sm:$0xff]  ;;  %s561_s25 = sshra.s32 %s315_s24, 4  ;;  %s567_s8 = scalar_lea.hbm %s793_s3, 16  ;;  %s562_s25 = int_to_ptr.hbm [resolvable:$true] %s561_s25 }
  0x34   : > { %v482_v35 = vld [vmem:[%s792_s2] ss:$0 sm:$0xff]  ;;  %s563_s27 = scalar_lea.hbm %s562_s25, 8  ;;  %p568_p12 = scmp.lt.s32.totalorder %s562_s25, %s793_s3 }
  0x35   : > { %258 = vmatpush.msra.mxu0 %v249_v5  ;;  %p564_p1 = scmp.ne.s32.totalorder %s562_s25, %s563_s27  ;;  %p569_p8 = scmp.lt.s32.totalorder %s567_s8, %s563_s27 }
  0x37   : > { %259 = vmatpush.msra.mxu0 %v248_v6  ;;  %p565_p3 = pnand %p564_p1, %p707_p13  ;;  %p570_p7 = por %p569_p8, %p568_p12 }
  0x38   : > { %478 = vset.pattern.permute.xlu0 %v624_v8  ;;  %480 = vset.pattern.permute.xlu1 %v625_v9 }
  0x39   : > { %216 = vperm.xlu0 %478, %v205_v2   ;;  %230 = vperm.xlu1 %480, %v205_v2   ;;  %p566_p5 = pneg %p565_p3 }
  0x3a   : > { %260 = vmatpush.msra.mxu0 %v247_v7 }
  0x3b   : > { %p571_p9 = pnand %p570_p7, %p566_p5 }
  0x3c   : > { %261 = vmatpush.msra.mxu0 %v246_v10 }
  0x3e   : > { %262 = vmatpush.msra.mxu0 %v245_v11 }
  0x40   : > { %263 = vmatpush.msra.mxu0 %v244_v12 }
  0x41   : > { %481 = vset.pattern.permute.xlu0 %v625_v9 }
  0x42   : > { %264 = vmatpush.msra.mxu0 %v243_v13 }
  0x44   : > { %265 = vmatpush.msra.mxu0 %v242_v14 }
  0x46   : > { %266 = vmatpush.msra.mxu0 %v241_v15 }
  0x48   : > { %267 = vmatpush.msra.mxu0 %v240_v16 }
  0x4a   : > { %268 = vmatpush.msra.mxu0 %v239_v17 }
  0x4c   : > { %269 = vmatpush.msra.mxu0 %v238_v18 }
  0x4e   : > { %270 = vmatpush.msra.mxu0 %v237_v19 }
  0x50   : > { %271 = vmatpush.msra.mxu0 %v236_v20 }
  0xa2   : > { %v210_v22 = vpop.permute.xlu0 %209  ;;  %v224_v23 = vpop.permute.xlu1 %223 }
  0xa3   : > { %vm211_vm0 = vcmp.eq.s32.totalorder %v207_v24, %v210_v22  ;;  %vm225_vm1 = vcmp.eq.s32.totalorder %v207_v24, %v224_v23 }
  0xa4   : > { %v405_v28 = vsel %vm211_vm0, 1.0, %v626_v27  ;;  %v407_v31 = vsel %vm225_vm1, 1.0, %v626_v27 }
  0xab   : > { %v217_v25 = vpop.permute.xlu0 %216  ;;  %v231_v26 = vpop.permute.xlu1 %230 }
  0xac   : > { %vm218_vm2 = vcmp.eq.s32.totalorder %v207_v24, %v217_v25  ;;  %vm232_vm3 = vcmp.eq.s32.totalorder %v207_v24, %v231_v26 }
  0xad   : > { %v406_v29 = vsel %vm218_vm2, 1.0, %v626_v27  ;;  %v408_v32 = vsel %vm232_vm3, 1.0, %v626_v27 }
  0xae   : > { %v221_v30 = vadd.f32 %v406_v29, %v405_v28 }
  0xb0   : > { %v228_v33 = vadd.f32 %v407_v31, %v221_v30 }
  0xb2   : > { %v235_v34 = vadd.f32 %v408_v32, %v228_v33 }
  0xb4   : > { %272 = vmatmul.f32.vlgmr.msra.gmra.mxu0 %v235_v34 }
 0x131   : > { %v273_v36 = vpop.f32.mrf.mxu0 }
 0x132   : > { %v274_v37 = vadd.f32 %v482_v35, %v273_v36 }
 0x134   : > { %276 = vmax.xlane.f32.xlu2 %v274_v37 }
 0x1a7   : > { %v277_v38 = vpop.xlane.xlu2 %276 }
 0x1a8   : > { %v278_v39 = vsub.f32 %v274_v37, %v277_v38 }
 0x1aa   : > { %v279_v40 = vmul.f32 1.442695, %v278_v39 }
 0x1ac   : > { %483 = vpow2.f32 %v279_v40 }
 0x1b2   : > { %v484_v41 = vpop.eup %483 }
 0x1b3   : > { %281 = vadd.xlane.f32.xlu2 %v484_v41 }
 0x226   : > { %v282_v42 = vpop.xlane.xlu2 %281 }
 0x227   : > { %485 = vrcp.f32 %v282_v42  ;;  %v294_v46 = vand.u32 2147483648, %v282_v42  ;;  %v292_v48 = vand.u32 2147483647, %v282_v42  ;;  %vm288_vm5 = vweird.f32 %v282_v42 }
 0x229   : > { %v295_v50 = vor.u32 1.1754944e-38, %v294_v46  ;;  %vm293_vm7 = vcmp.eq.f32.partialorder %v292_v48, 8.507059e+37 }
 0x22d   : > { %v486_v43 = vpop.eup %485 }
 0x22e   : > { %v284_v44 = vmul.f32 %v486_v43, %v282_v42  ;;  %vm289_vm4 = vweird.f32 %v486_v43 }
 0x22f   : > { %vm290_vm6 = vmor %vm288_vm5, %vm289_vm4 }
 0x230   : > { %v285_v45 = vsub.f32 1.0, %v284_v44 }
 0x232   : > { %v286_v47 = vmul.f32 %v486_v43, %v285_v45 }
 0x234   : > { %v287_v49 = vadd.f32 %v486_v43, %v286_v47 }
 0x236   : > { %v291_v51 = vsel %vm290_vm6, %v486_v43, %v287_v49 }
 0x237   : > { %v296_v52 = vsel %vm293_vm7, %v295_v50, %v291_v51 }
 0x238   : > { %v297_v53 = vmul.f32 %v484_v41, %v296_v52 }
 0x23a   : > { %298 = vst [vmem:[%s204_s22] sm:$0xff] %v297_v53 }
 0x23b   : > { %574 = shalt.err (!%p571_p9)
}
 0x23c   : > { %419 = dma.vmem_to_hbm [thread:$0]  (%p707_p13), %s313_s23, 128, %s315_s24, %s300_s19  }
 0x23d PF: > { %s326_s5 = sand.u32 1, %s605_s12   ;;  %p799_p10 = scmp.ge.s32.totalorder %s617_s15, 2 }
 0x23e   : > { %s327_s11 = scalar_lea.sflag [#allocation4], %s326_s5 }
 0x23f   : > { %p430_p11 = pnand %p799_p10, %p712_p4 }
 0x241   : > { %p431_p0 = pneg %p430_p11 }
 0x243   : > { %600 = dma.done.wait (%p431_p0), %s327_s11, 128  }
 0x244   : > { %602 = vsyncadd (%p431_p0), %s327_s11, 4294967168  ;;  %p17_p2 = scmp.ge.s32.totalorder %s687_s26, 4   ;;  %s800_s12 = smov %s609_s13 }
 0x245   : > { %s801_s13 = smov %s613_s14  ;;  %s802_s14 = smov %s699_s29 }
 0x246   : > { %s803_s15 = smov %s687_s26  ;;  %19 = sbr.rel (!%p17_p2) target bundleno = 6 (0x6), region = 81 }
 0x24b   :  { %333 = vsyncpa [#allocation3], 1 }
 0x24c   :  { %335 = vsyncpa [#allocation3 + $0x1], 1 }
 0x24d   :  { %336 = vsyncpa [#allocation6], 1 }
 0x24e   :  { %337 = vsyncpa [#allocation4], 1 }
 0x24f   :  { %339 = vsyncpa [#allocation4 + $0x1], 1 }

</bundles_post_ra>
